<compile_context>
chip_gen: v7x
topology: tpu7x:2x2x1
jax: 0.10.0
libtpu: 0.0.40
codegen_flags: <defaults>
</compile_context>

<pallas_src>
import functools

import jax
import jax.numpy as jnp
import numpy as np
from jax import lax
from jax.experimental import pallas as pl
from jax.experimental.pallas import tpu as pltpu


def _pick_tile_hw(hw, c, x_itemsize, budget_bytes=8 * 1024 * 1024):
    """Lane tile over the flattened spatial axis (H*W).

    Must be a multiple of 128 that divides HW; otherwise fall back to the full
    spatial extent (always a legal block dim).  Sized so double-buffered
    x + out + patches + pooled tiles stay within a conservative VMEM budget.
    """
    if hw % 128 != 0:
        return hw

    def tile_bytes(t):
        # x tile + gated-out tile (x dtype) + patches tile (bf16) + pooled
        # tile (bf16), double-buffered by the pipeline.
        return 2 * t * (2 * c * x_itemsize + 98 * 2 + 2 * 2)

    t = hw
    while t % 256 == 0 and tile_bytes(t) > budget_bytes:
        t //= 2
    return t


# --------------------- Kernel 1: ChannelPool (max & mean) ---------------------
def _channel_pool_kernel(x_ref, o_ref):
    # x_ref: (1, C, T)   o_ref: (1, 2, T)  row 0 = max over C, row 1 = mean.
    x = x_ref[0].astype(jnp.float32)
    mx = jnp.max(x, axis=0, keepdims=True)
    mn = jnp.mean(x, axis=0, keepdims=True)
    o_ref[0] = jnp.concatenate([mx, mn], axis=0).astype(o_ref.dtype)


# ------------- Kernel 2: conv (as GEMM) + BN bias + sigmoid + gate ------------
def _conv_sigmoid_gate_kernel(w_ref, b_ref, p_ref, x_ref, o_ref):
    # w_ref: (8, K)     bf16, row 0 = BN-scale-folded conv weight, rows 1..7 zero
    # b_ref: (1, 1)     f32 folded BN bias
    # p_ref: (1, K, T)  bf16 im2col patches for this batch / spatial tile
    # x_ref: (1, C, T)  original input tile
    # o_ref: (1, C, T)  gated output tile
    acc = jnp.dot(w_ref[...], p_ref[0],
                  preferred_element_type=jnp.float32)            # (8, T) on MXU
    y0 = acc[0:1, :] + b_ref[...]                                # conv + BN bias
    gate = pl.reciprocal(1.0 + jnp.exp(-y0), approx=True)        # sigmoid (EUP)
    o_ref[0] = (x_ref[0].astype(jnp.float32) * gate).astype(o_ref.dtype)


@functools.partial(jax.jit, static_argnames=("kernel_size", "padding"))
def spatial_gate_forward(x_nchw, weight_oihw, gamma, beta, running_mean,
                         running_var, *, kernel_size=7, padding=3, eps=1e-5):
    n, c, h, w = x_nchw.shape
    cout, cin, kh, kw = weight_oihw.shape
    assert (cout, cin, kh, kw) == (1, 2, kernel_size, kernel_size)

    hw = h * w
    k_dim = cin * kh * kw                                        # = 98
    t_hw = _pick_tile_hw(hw, c, x_nchw.dtype.itemsize)
    grid = (n, hw // t_hw)
    vmem_limit = 32 * 1024 * 1024  # <= physical scoped VMEM on all generations

    x_flat = x_nchw.reshape(n, c, hw)          # free reshape — no transpose/copy

    # ---- Pallas kernel 1: ChannelPool (max & mean over C), bf16 output ----
    pooled = pl.pallas_call(
        _channel_pool_kernel,
        out_shape=jax.ShapeDtypeStruct((n, 2, hw), jnp.bfloat16),
        grid_spec=pltpu.PrefetchScalarGridSpec(
            num_scalar_prefetch=0,
            grid=grid,
            in_specs=[pl.BlockSpec((1, c, t_hw), lambda b, j: (b, 0, j))],
            out_specs=pl.BlockSpec((1, 2, t_hw), lambda b, j: (b, 0, j)),
        ),
        compiler_params=pltpu.CompilerParams(
            dimension_semantics=("parallel", "parallel"),
            vmem_limit_bytes=vmem_limit),
        cost_estimate=pl.CostEstimate(
            flops=int(2 * n * c * hw),
            transcendentals=0,
            bytes_accessed=int(n * c * hw * x_nchw.dtype.itemsize
                               + n * 2 * hw * 2)),
    )(x_flat)

    # ---- glue: spatial zero-pad + im2col of the tiny 2-channel pooled map ----
    pooled_nchw = pooled.reshape(n, 2, h, w)
    xp = jnp.pad(pooled_nchw,
                 ((0, 0), (0, 0), (padding, padding), (padding, padding)))
    cols = []
    for ki in range(kh):
        for kj in range(kw):
            cols.append(xp[:, :, ki:ki + h, kj:kj + w])          # (N, 2, H, W)
    # K order = (cin, ki, kj) to match weight.reshape(1, cin*kh*kw)
    patches = jnp.stack(cols, axis=2).reshape(n, k_dim, hw).astype(jnp.bfloat16)

    # ---- glue: fold eval-mode BN scale into weight, pad weight rows 1 -> 8 ----
    bn_scale = gamma / jnp.sqrt(running_var + eps)               # (1,)
    bn_bias = beta - running_mean * bn_scale                     # (1,)
    w_row = (weight_oihw.reshape(1, k_dim) * bn_scale[:, None]).astype(jnp.bfloat16)
    w_mat = jnp.zeros((8, k_dim), jnp.bfloat16).at[0:1, :].set(w_row)
    b_mat = bn_bias.reshape(1, 1).astype(jnp.float32)

    flops = 2 * 8 * k_dim * n * hw + 4 * n * c * hw
    bytes_accessed = (patches.size * 2                           # bf16 patches
                      + 2 * n * c * hw * x_nchw.dtype.itemsize   # x in + out
                      + 8 * k_dim * 2 + 4)

    # ---- Pallas kernel 2: conv-GEMM + BN + sigmoid + gate (lane-dense) ----
    out_flat = pl.pallas_call(
        _conv_sigmoid_gate_kernel,
        out_shape=jax.ShapeDtypeStruct((n, c, hw), x_nchw.dtype),
        grid_spec=pltpu.PrefetchScalarGridSpec(
            num_scalar_prefetch=0,
            grid=grid,
            in_specs=[
                pl.BlockSpec((8, k_dim), lambda b, j: (0, 0)),       # folded weight
                pl.BlockSpec((1, 1), lambda b, j: (0, 0)),           # folded bias
                pl.BlockSpec((1, k_dim, t_hw), lambda b, j: (b, 0, j)),  # patches
                pl.BlockSpec((1, c, t_hw), lambda b, j: (b, 0, j)),      # x tile
            ],
            out_specs=pl.BlockSpec((1, c, t_hw), lambda b, j: (b, 0, j)),
        ),
        compiler_params=pltpu.CompilerParams(
            dimension_semantics=("parallel", "parallel"),
            vmem_limit_bytes=vmem_limit),
        cost_estimate=pl.CostEstimate(
            flops=int(flops),
            transcendentals=int(n * hw),
            bytes_accessed=int(bytes_accessed)),
    )(w_mat, b_mat, patches, x_flat)

    return out_flat.reshape(n, c, h, w)


if __name__ == "__main__":
    # SpatialGate on x of shape (N=2, C=4, H=16, W=16)
    N, C, H, W = 2, 4, 16, 16
    ksize, pad = 7, (7 - 1) // 2

    key = jax.random.PRNGKey(0)
    kx, kw_, km, kv = jax.random.split(key, 4)
    x = jax.random.normal(kx, (N, C, H, W), dtype=jnp.float32)
    weight = jax.random.normal(kw_, (1, 2, ksize, ksize), dtype=jnp.float32) * 0.1
    # Deterministic eval-mode BatchNorm parameters / running stats.
    gamma = jnp.array([1.1], dtype=jnp.float32)
    beta = jnp.array([0.05], dtype=jnp.float32)
    running_mean = 0.01 * jax.random.normal(km, (1,), dtype=jnp.float32)
    running_var = 1.0 + 0.1 * jax.random.uniform(kv, (1,), dtype=jnp.float32)

    out = spatial_gate_forward(x, weight, gamma, beta, running_mean, running_var,
                               kernel_size=ksize, padding=pad)
    out = jax.block_until_ready(out)

    # Pure-JAX f32 reference with the same forward semantics.
    x_comp = jnp.concatenate([jnp.max(x, axis=1, keepdims=True),
                              jnp.mean(x, axis=1, keepdims=True)], axis=1)
    conv = lax.conv_general_dilated(
        x_comp, weight, window_strides=(1, 1),
        padding=((pad, pad), (pad, pad)),
        dimension_numbers=("NCHW", "OIHW", "NCHW"))
    s = gamma / jnp.sqrt(running_var + 1e-5)
    b = beta - running_mean * s
    gate = jax.nn.sigmoid(conv * s[None, :, None, None] + b[None, :, None, None])
    ref = x * gate

    assert out.shape == (N, C, H, W), out.shape
    # bf16 MXU operands (f32 accumulation) -> slightly relaxed tolerance.
    np.testing.assert_allclose(np.asarray(out), np.asarray(ref), rtol=2e-2, atol=2e-2)
    print("KERNEL_OK")
</pallas_src>

<mosaic_0001>
module attributes {stable_mosaic.version = 11 : i64} {
  func.func @_channel_pool_kernel(%arg0: i32, %arg1: i32, %arg2: memref<1x4x256xf32, #tpu.memory_space<vmem>>, %arg3: memref<1x2x256xbf16, #tpu.memory_space<vmem>>) attributes {dimension_semantics = [#tpu.dimension_semantics<parallel>, #tpu.dimension_semantics<parallel>], iteration_bounds = array<i64: 2, 1>, scalar_prefetch = 0 : i64, scratch_operands = 0 : i64, tpu.core_type = #tpu.core_type<tc>, window_params = [{transform_indices = @transform_0, window_bounds = array<i64: 1, 4, 256>}, {transform_indices = @transform_1, window_bounds = array<i64: 1, 2, 256>}]} {
    %c0 = arith.constant 0 : index
    %c0_0 = arith.constant 0 : index
    %c0_1 = arith.constant 0 : index
    %0 = vector.load %arg2[%c0, %c0_0, %c0_1] : memref<1x4x256xf32, #tpu.memory_space<vmem>>, vector<1x4x256xf32>
    %1 = vector.shape_cast %0 : vector<1x4x256xf32> to vector<4x256xf32>
    %cst = arith.constant dense<0xFF800000> : vector<256xf32>
    %2 = vector.multi_reduction <maximumf>, %1, %cst [0] : vector<4x256xf32> to vector<256xf32>
    %3 = vector.shape_cast %2 : vector<256xf32> to vector<1x256xf32>
    %cst_2 = arith.constant dense<0.000000e+00> : vector<256xf32>
    %4 = vector.multi_reduction <add>, %1, %cst_2 [0] : vector<4x256xf32> to vector<256xf32>
    %5 = vector.shape_cast %4 : vector<256xf32> to vector<1x256xf32>
    %cst_3 = arith.constant 4.000000e+00 : f32
    %6 = vector.broadcast %cst_3 : f32 to vector<1x256xf32>
    %7 = arith.divf %5, %6 : vector<1x256xf32>
    %8 = tpu.concatenate %3, %7 in 0 : vector<1x256xf32>, vector<1x256xf32> -> vector<2x256xf32>
    %9 = arith.truncf %8 : vector<2x256xf32> to vector<2x256xbf16>
    %c0_4 = arith.constant 0 : index
    %c0_5 = arith.constant 0 : index
    %c0_6 = arith.constant 0 : index
    %10 = vector.load %arg3[%c0_4, %c0_5, %c0_6] : memref<1x2x256xbf16, #tpu.memory_space<vmem>>, vector<1x2x256xbf16>
    %11 = vector.shape_cast %10 : vector<1x2x256xbf16> to vector<2x256xbf16>
    %12 = vector.shape_cast %9 : vector<2x256xbf16> to vector<1x2x256xbf16>
    tpu.vector_store %arg3[%c0_4, %c0_5, %c0_6], %12 {strides = array<i32>} : memref<1x2x256xbf16, #tpu.memory_space<vmem>>, vector<1x2x256xbf16>,
    return
  }
  func.func @transform_0(%arg0: i32, %arg1: i32) -> (i32, i32, i32) {
    %c0_i32 = arith.constant 0 : i32
    %c0_i32_0 = arith.constant 0 : i32
    return %arg0, %c0_i32, %arg1 : i32, i32, i32
  }
  func.func @transform_1(%arg0: i32, %arg1: i32) -> (i32, i32, i32) {
    %c0_i32 = arith.constant 0 : i32
    %c0_i32_0 = arith.constant 0 : i32
    return %arg0, %c0_i32, %arg1 : i32, i32, i32
  }
}

module attributes {stable_mosaic.version = 11 : i64} {
  func.func @_conv_sigmoid_gate_kernel(%arg0: i32, %arg1: i32, %arg2: memref<8x98xbf16, #tpu.memory_space<vmem>>, %arg3: memref<1x1xf32, #tpu.memory_space<vmem>>, %arg4: memref<1x98x256xbf16, #tpu.memory_space<vmem>>, %arg5: memref<1x4x256xf32, #tpu.memory_space<vmem>>, %arg6: memref<1x4x256xf32, #tpu.memory_space<vmem>>) attributes {dimension_semantics = [#tpu.dimension_semantics<parallel>, #tpu.dimension_semantics<parallel>], iteration_bounds = array<i64: 2, 1>, scalar_prefetch = 0 : i64, scratch_operands = 0 : i64, tpu.core_type = #tpu.core_type<tc>, window_params = [{pipeline_mode = #tpu.pipeline_mode<synchronous>, transform_indices = @transform_0, window_bounds = array<i64: 8, 98>}, {pipeline_mode = #tpu.pipeline_mode<synchronous>, transform_indices = @transform_1, window_bounds = array<i64: 1, 1>}, {transform_indices = @transform_2, window_bounds = array<i64: 1, 98, 256>}, {transform_indices = @transform_3, window_bounds = array<i64: 1, 4, 256>}, {transform_indices = @transform_4, window_bounds = array<i64: 1, 4, 256>}]} {
    %c0 = arith.constant 0 : index
    %c0_0 = arith.constant 0 : index
    %0 = vector.load %arg2[%c0, %c0_0] : memref<8x98xbf16, #tpu.memory_space<vmem>>, vector<8x98xbf16>
    %c0_1 = arith.constant 0 : index
    %c0_2 = arith.constant 0 : index
    %c0_3 = arith.constant 0 : index
    %1 = vector.load %arg4[%c0_1, %c0_2, %c0_3] : memref<1x98x256xbf16, #tpu.memory_space<vmem>>, vector<1x98x256xbf16>
    %2 = vector.shape_cast %1 : vector<1x98x256xbf16> to vector<98x256xbf16>
    %cst = arith.constant dense<0.000000e+00> : vector<8x256xf32>
    %3 = tpu.matmul %0, %2, %cst {dimension_numbers = #tpu.dot_dimension_numbers<[1], [0], [0], [1], [0, 0, 1, 1], [], []>} : vector<8x98xbf16>, vector<98x256xbf16>, vector<8x256xf32> -> vector<8x256xf32>
    %4 = vector.extract_strided_slice %3 {offsets = [0, 0], sizes = [1, 256], strides = [1, 1]} : vector<8x256xf32> to vector<1x256xf32>
    %c0_4 = arith.constant 0 : index
    %c0_5 = arith.constant 0 : index
    %5 = vector.load %arg3[%c0_4, %c0_5] : memref<1x1xf32, #tpu.memory_space<vmem>>, vector<1x1xf32>
    %6 = vector.broadcast %5 : vector<1x1xf32> to vector<1x256xf32>
    %7 = arith.addf %4, %6 : vector<1x256xf32>
    %cst_6 = arith.constant 0.000000e+00 : f32
    %8 = vector.broadcast %cst_6 : f32 to vector<1x256xf32>
    %9 = arith.subf %8, %7 : vector<1x256xf32>
    %10 = math.exp %9 : vector<1x256xf32>
    %cst_7 = arith.constant 1.000000e+00 : f32
    %11 = vector.broadcast %cst_7 : f32 to vector<1x256xf32>
    %12 = arith.addf %11, %10 : vector<1x256xf32>
    %13 = tpu.reciprocal %12 {approx = true} : vector<1x256xf32> -> vector<1x256xf32>
    %c0_8 = arith.constant 0 : index
    %c0_9 = arith.constant 0 : index
    %c0_10 = arith.constant 0 : index
    %14 = vector.load %arg5[%c0_8, %c0_9, %c0_10] : memref<1x4x256xf32, #tpu.memory_space<vmem>>, vector<1x4x256xf32>
    %15 = vector.shape_cast %14 : vector<1x4x256xf32> to vector<4x256xf32>
    %16 = vector.broadcast %13 : vector<1x256xf32> to vector<4x256xf32>
    %17 = arith.mulf %15, %16 : vector<4x256xf32>
    %c0_11 = arith.constant 0 : index
    %c0_12 = arith.constant 0 : index
    %c0_13 = arith.constant 0 : index
    %18 = vector.load %arg6[%c0_11, %c0_12, %c0_13] : memref<1x4x256xf32, #tpu.memory_space<vmem>>, vector<1x4x256xf32>
    %19 = vector.shape_cast %18 : vector<1x4x256xf32> to vector<4x256xf32>
    %20 = vector.shape_cast %17 : vector<4x256xf32> to vector<1x4x256xf32>
    tpu.vector_store %arg6[%c0_11, %c0_12, %c0_13], %20 {strides = array<i32>} : memref<1x4x256xf32, #tpu.memory_space<vmem>>, vector<1x4x256xf32>,
    return
  }
  func.func @transform_0(%arg0: i32, %arg1: i32) -> (i32, i32) {
    %c0_i32 = arith.constant 0 : i32
    %c0_i32_0 = arith.constant 0 : i32
    %c0_i32_1 = arith.constant 0 : i32
    return %c0_i32, %c0_i32_0 : i32, i32
  }
  func.func @transform_1(%arg0: i32, %arg1: i32) -> (i32, i32) {
    %c0_i32 = arith.constant 0 : i32
    %c0_i32_0 = arith.constant 0 : i32
    %c0_i32_1 = arith.constant 0 : i32
    return %c0_i32, %c0_i32_0 : i32, i32
  }
  func.func @transform_2(%arg0: i32, %arg1: i32) -> (i32, i32, i32) {
    %c0_i32 = arith.constant 0 : i32
    %c0_i32_0 = arith.constant 0 : i32
    return %arg0, %c0_i32, %arg1 : i32, i32, i32
  }
  func.func @transform_3(%arg0: i32, %arg1: i32) -> (i32, i32, i32) {
    %c0_i32 = arith.constant 0 : i32
    %c0_i32_0 = arith.constant 0 : i32
    return %arg0, %c0_i32, %arg1 : i32, i32, i32
  }
  func.func @transform_4(%arg0: i32, %arg1: i32) -> (i32, i32, i32) {
    %c0_i32 = arith.constant 0 : i32
    %c0_i32_0 = arith.constant 0 : i32
    return %arg0, %c0_i32, %arg1 : i32, i32, i32
  }
}

</mosaic_0001>

<bundles_post_ra>
// kernel: spatial_gate_forward.2
= control target key start
LH: loop header
LB: loop body
LE: loop exit
PB: predicated region body
PF: predicated region fallthrough
CT: control target
= control target key end

     0   :  { %s369_s6 = smov 0   ;;  %s371_s7 = smov 0   ;;  %s406_s0 = inlined_call_operand.vmem [shape: f32[2,4,256], index: 0, kind: input, shape index: {}]   ;;  %s407_s1 = inlined_call_operand.vmem [shape: bf16[2,2,256], index: 1, kind: output, shape index: {}]  }
   0x1   :  { %s373_s8 = smov 0  }
   0x2 LB: > { %s23_s9 = sadd.s32 1, %s352_s7  ;;  %p299_p0 = scmp.ge.s32.totalorder %s356_s8, 1  ;;  %s356_s8 = sphi %s373_s8, %s11_s8   ;;  %s352_s7 = sphi %s371_s7, %s409_s7   ;;  %s348_s6 = sphi %s369_s6, %s408_s6  }
   0x3   : > { %p25_p1 = scmp.ge.s32.totalorder %s23_s9, 2  ;;  %p108_p2 = scmp.lt.s32.totalorder %s356_s8, 3 }
   0x5   : > { %s411_s9 = smov (%p25_p1, %s23_s9), 0  ;;  %p109_p3 = pnand %p299_p0, %p108_p2 }
   0x6   : > { %p136_p4 = scmp.lt.s32.totalorder (!%p109_p3), %s348_s6, 1  ;;  %vm158_vm0 = vcmask (!%p109_p3), 1043456   ;;  %v358_v20 = vmov (!%p109_p3), 1966171168   ;;  %v201_v22 = vlaneseq (!%p109_p3)  ;;  %vm190_vm1 = vcmask (!%p109_p3), 1040384  }
   0x7   : > { %112 = sbr.rel (%p109_p3) target bundleno = 41 (0x29), region = 24  ;;  %v199_v21 = vunpack.c.l.s4 (!%p109_p3), %v358_v20 }
   0x8   : > { %v202_v32 = vshrl.u32 (!%p109_p3), %v201_v22, 7 }
   0x9   : > { %v200_v31 = vunpack.c.0.s8 (!%p109_p3), %v199_v21 }
   0xb   : > { %v203_v38 = vsub.s32 (!%p109_p3), %v200_v31, %v202_v32 }
   0xe   : > { %s413_s6 = smov (!%p136_p4, %s348_s6), 1 }
   0xf   : > { %s307_s10 = sshll.u32 %s413_s6, 3  ;;  %s302_s14 = sshll.u32 %s413_s6, 1 }
  0x10   : > { %s143_s13 = scalar_lea.vmem %s406_s0, %s307_s10  ;;  %s152_s17 = scalar_lea.vmem %s407_s1, %s302_s14 }
  0x11   : > { %v154_v0 = vld [vmem:[%s143_s13] sm:$0xff] }
  0x12   : > { %v156_v1 = vcombine.high %v154_v0, %v154_v0  ;;  %v159_v2 = vsel %vm158_vm0, %v154_v0, -inf  ;;  %v173_v3 = vsel %vm158_vm0, %v154_v0, 0.0 }
  0x13   : > { %v160_v4 = vrot.slane %v159_v2, 4  ;;  %v174_v5 = vrot.slane %v173_v3, 4 }
  0x14   : > { %v166_v6 = vsel %vm158_vm0, %v156_v1, -inf  ;;  %v180_v7 = vsel %vm158_vm0, %v156_v1, 0.0 }
  0x15   : > { %v161_v8 = vmax.f32 %v159_v2, %v160_v4  ;;  %v167_v9 = vrot.slane %v166_v6, 4  ;;  %v175_v10 = vadd.f32 %v174_v5, %v173_v3  ;;  %v181_v11 = vrot.slane %v180_v7, 4 }
  0x17   : > { %v162_v12 = vrot.slane %v161_v8, 2  ;;  %v168_v13 = vmax.f32 %v166_v6, %v167_v9  ;;  %v176_v14 = vrot.slane %v175_v10, 2  ;;  %v182_v15 = vadd.f32 %v181_v11, %v180_v7 }
  0x19   : > { %v163_v16 = vmax.f32 %v161_v8, %v162_v12  ;;  %v169_v17 = vrot.slane %v168_v13, 2  ;;  %v177_v18 = vadd.f32 %v176_v14, %v175_v10  ;;  %v183_v19 = vrot.slane %v182_v15, 2 }
  0x1b   : > { %v164_v23 = vrot.slane %v163_v16, 1  ;;  %v170_v24 = vmax.f32 %v168_v13, %v169_v17  ;;  %v178_v25 = vrot.slane %v177_v18, 1  ;;  %v184_v26 = vadd.f32 %v183_v19, %v182_v15 }
  0x1d   : > { %v165_v27 = vmax.f32 %v163_v16, %v164_v23  ;;  %v171_v28 = vrot.slane %v170_v24, 1  ;;  %v179_v29 = vadd.f32 %v178_v25, %v177_v18  ;;  %v185_v30 = vrot.slane %v184_v26, 1 }
  0x1f   : > { %v172_v33 = vmax.f32 %v170_v24, %v171_v28  ;;  %v186_v34 = vadd.f32 %v185_v30, %v184_v26  ;;  %v188_v35 = vmul.f32 0.25, %v179_v29 }
  0x21   : > { %v189_v36 = vmul.f32 0.25, %v186_v34  ;;  %v191_v37 = vsel %vm190_vm1, %v165_v27, %v188_v35 }
  0x23   : > { %v192_v39 = vsel %vm190_vm1, %v172_v33, %v189_v36 }
  0x24   : > { %v303_v40 = vpack.c.bf16 %v192_v39, %v191_v37 }
  0x26   : > { %v204_v41 = vrot.slane %v303_v40, %v203_v38 }
  0x28   : > { %304 = vst.sshfl [vmem:[%s152_s17] sm:$0x5 pattern:$0x73625140] %v204_v41 }
  0x29 PF: > { %s11_s8 = sadd.s32 1, %s356_s8   ;;  %s408_s6 = smov %s352_s7 }
  0x2a   : > { %p8_p5 = scmp.ge.s32.totalorder %s11_s8, 4   ;;  %s409_s7 = smov %s411_s9 }
  0x2c   :  { %10 = sbr.rel (!%p8_p5) target bundleno = 2 (0x2), region = 54 }

// kernel: spatial_gate_forward.3
= control target key start
LH: loop header
LB: loop body
LE: loop exit
PB: predicated region body
PF: predicated region fallthrough
CT: control target
= control target key end

     0   :  { %s687_s17 = smov 0   ;;  %s689_s18 = smov 0   ;;  %s730_s0 = inlined_call_operand.vmem [shape: bf16[8,98], index: 0, kind: input, shape index: {}]   ;;  %s731_s1 = inlined_call_operand.<no memory space> [shape: f32[1,1], index: 1, kind: input, shape index: {}]   ;;  %s732_s2 = inlined_call_operand.vmem [shape: bf16[2,98,256], index: 2, kind: input, shape index: {}]   ;;  %s733_s3 = inlined_call_operand.vmem [shape: f32[2,4,256], index: 3, kind: input, shape index: {}]   ;;  %s734_s4 = inlined_call_operand.vmem [shape: f32[2,4,256], index: 4, kind: output, shape index: {}]  }
   0x1   :  { %v9_v0 = vstv %s731_s1  ;;  %s691_s19 = smov 0  }
   0x2   :  { %10 = vst [vmem:[#allocation2] sm:$0x1] %v9_v0 }
   0x3 LB: > { %s28_s1 = sadd.s32 1, %s652_s18  ;;  %p553_p0 = scmp.ge.s32.totalorder %s656_s19, 1  ;;  %s656_s19 = sphi %s691_s19, %s16_s19   ;;  %s652_s18 = sphi %s689_s18, %s736_s18   ;;  %s648_s17 = sphi %s687_s17, %s735_s17  }
   0x4   : > { %p30_p1 = scmp.ge.s32.totalorder %s28_s1, 2  ;;  %p202_p2 = scmp.lt.s32.totalorder %s656_s19, 3 }
   0x6   : > { %s738_s1 = smov (%p30_p1, %s28_s1), 0  ;;  %p203_p3 = pnand %p553_p0, %p202_p2 }
   0x7   : > { %p246_p4 = scmp.lt.s32.totalorder (!%p203_p3), %s648_s17, 1  ;;  %v658_v1 = vmov (!%p203_p3), 0   ;;  %vm359_vm0 = vcmask (!%p203_p3), 1040384   ;;  %v276_v19 = vld [vmem:[%s730_s0] sm:$0xf] (!%p203_p3)  ;;  %vm355_vm1 = vcmask (!%p203_p3), 801792   ;;  %v413_v20 = vlaneseq (!%p203_p3) }
   0x8   : > { %206 = sbr.rel (%p203_p3) target bundleno = 298 (0x12a), region = 36  ;;  %398 = vmatprep.mubr.bf16.mxu0 (!%p203_p3), %v658_v1  ;;  %605 = vset.pattern.permute.xlu0 (!%p203_p3), %v658_v1 }
   0x9   : > { %v407_v2 = vld [vmem:[#allocation2] sm:$0x1] (!%p203_p3)  ;;  %v414_v21 = vshrl.u32 (!%p203_p3), %v413_v20, 7 }
   0xa   : > { %410 = vperm.xlu0 (!%p203_p3), %605, %v407_v2  }
   0xb   : > { %v415_v22 = vsub.s32 (!%p203_p3), 0, %v414_v21 }
   0xf   : > { %s740_s17 = smov (!%p246_p4, %s648_s17), 1 }
  0x10   : > { %s579_s20 = smul.u32 104, %s740_s17  ;;  %s577_s26 = sshll.u32 %s740_s17, 3 }
  0x11   : > { %s263_s29 = scalar_lea.vmem %s733_s3, %s577_s26  ;;  %s273_s6 = scalar_lea.vmem %s734_s4, %s577_s26 }
  0x12   : > { %s253_s23 = scalar_lea.vmem %s732_s2, %s579_s20  ;;  %v429_v43 = vld [vmem:[%s263_s29] sm:$0xff] }
  0x13   : > { %v606_v3 = vld [vmem:[%s253_s23 + $0x4] ss:$8 sps:$4 sm:$0xff]   ;;  %v608_v4 = vld [vmem:[%s253_s23] ss:$8 sps:$4 sm:$0xff]   ;;  %v609_v5 = vld [vmem:[%s253_s23 + $0x14] ss:$8 sps:$4 sm:$0xff]  }
  0x14   : > { %366 = vmatprep.subr.bf16.mxu0 %v606_v3  ;;  %v611_v6 = vld [vmem:[%s253_s23 + $0x10] ss:$8 sps:$4 sm:$0xff]   ;;  %v612_v7 = vld [vmem:[%s253_s23 + $0x24] ss:$8 sps:$4 sm:$0xff]   ;;  %v614_v8 = vld [vmem:[%s253_s23 + $0x20] ss:$8 sps:$4 sm:$0xff]  }
  0x15   : > { %367 = vmatpush1.bf16.msra.mxu0 %v608_v4  ;;  %v615_v9 = vld [vmem:[%s253_s23 + $0x34] ss:$8 sps:$4 sm:$0xff]   ;;  %v617_v10 = vld [vmem:[%s253_s23 + $0x30] ss:$8 sps:$4 sm:$0xff]   ;;  %v618_v11 = vld [vmem:[%s253_s23 + $0x44] ss:$8 sps:$4 sm:$0xff]  }
  0x16   : > { %368 = vmatprep.subr.bf16.mxu0 %v609_v5  ;;  %v620_v12 = vld [vmem:[%s253_s23 + $0x40] ss:$8 sps:$4 sm:$0xff]   ;;  %v621_v13 = vld [vmem:[%s253_s23 + $0x54] ss:$8 sps:$4 sm:$0xff]   ;;  %v623_v15 = vld [vmem:[%s253_s23 + $0x50] ss:$8 sps:$4 sm:$0xff]  }
  0x17   : > { %v289_v14 = vld [vmem:[%s253_s23 + $0x60] sm:$0x11] }
  0x18   : > { %v572_v16 = vcombine.high %v289_v14, %v289_v14  ;;  %v571_v17 = vcombine.low %v289_v14, %v289_v14 }
  0x19   : > { %369 = vmatpush1.bf16.msra.mxu0 %v611_v6 }
  0x1a   : > { %370 = vmatprep.subr.bf16.mxu0 %v612_v7  ;;  %v361_v18 = vsel %vm359_vm0, %v571_v17, 0 }
  0x1d   : > { %371 = vmatpush1.bf16.msra.mxu0 %v614_v8 }
  0x1e   : > { %372 = vmatprep.subr.bf16.mxu0 %v615_v9 }
  0x21   : > { %373 = vmatpush1.bf16.msra.mxu0 %v617_v10 }
  0x22   : > { %374 = vmatprep.subr.bf16.mxu0 %v618_v11 }
  0x25   : > { %375 = vmatpush1.bf16.msra.mxu0 %v620_v12 }
  0x26   : > { %376 = vmatprep.subr.bf16.mxu0 %v621_v13 }
  0x29   : > { %377 = vmatpush1.bf16.msra.mxu0 %v623_v15 }
  0x2a   : > { %573 = vmatprep.subr.msk.bf16.mxu0 %vm359_vm0, %v572_v16 }
  0x2d   : > { %379 = vmatpush1.bf16.msra.mxu0 %v361_v18 }
  0x30   : > { %574 = vmatmul.mubr.msk.bf16.vlgmr.msra.gmra.mrb[0].mxu0 %vm355_vm1, %v276_v19 }
  0x89   : > { %v411_v23 = vpop.permute.xlu0 %410 }
  0x8a   : > { %v416_v24 = vrot.slane %v411_v23, %v415_v22 }
 0x103   : > { %v400_v25 = vpop.f32.mrb[0].mxu0 }
 0x104   : > { %v417_v26 = vadd.f32 %v416_v24, %v400_v25  ;;  %v402_v27 = vpop.f32.mrb[1].mxu0 }
 0x105   : > { %v418_v28 = vadd.f32 %v416_v24, %v402_v27  ;;  %v404_v29 = vpop.f32.mrb[2].mxu0 }
 0x106   : > { %v419_v30 = vsub.f32 0.0, %v417_v26  ;;  %v405_v31 = vpop.f32.mrb[3].mxu0 }
 0x107   : > { %v420_v32 = vsub.f32 0.0, %v418_v28 }
 0x108   : > { %v421_v33 = vmul.f32 1.442695, %v419_v30 }
 0x109   : > { %v423_v34 = vmul.f32 1.442695, %v420_v32 }
 0x10a   : > { %626 = vpow2.f32 %v421_v33 }
 0x10b   : > { %628 = vpow2.f32 %v423_v34 }
 0x114   : > { %v627_v35 = vpop.eup %626 }
 0x115   : > { %v629_v36 = vpop.eup %628  ;;  %v425_v37 = vadd.f32 1.0, %v627_v35 }
 0x116   : > { %v426_v38 = vadd.f32 1.0, %v629_v36 }
 0x117   : > { %630 = vrcp.f32 %v425_v37 }
 0x118   : > { %632 = vrcp.f32 %v426_v38 }
 0x121   : > { %v631_v39 = vpop.eup %630 }
 0x122   : > { %v633_v40 = vpop.eup %632  ;;  %v433_v41 = vrot.slane %v631_v39, %v415_v22 }
 0x123   : > { %v437_v42 = vrot.slane %v633_v40, %v415_v22 }
 0x125   : > { %v440_v44 = vcombine.low %v433_v41, %v437_v42 }
 0x127   : > { %v442_v45 = vmul.f32 %v440_v44, %v429_v43 }
 0x129   : > { %443 = vst [vmem:[%s273_s6] sm:$0xff] %v442_v45 }
 0x12a PF: > { %s16_s19 = sadd.s32 1, %s656_s19   ;;  %s735_s17 = smov %s652_s18 }
 0x12b   : > { %p13_p5 = scmp.ge.s32.totalorder %s16_s19, 4   ;;  %s736_s18 = smov %s738_s1 }
 0x12d   :  { %15 = sbr.rel (!%p13_p5) target bundleno = 3 (0x3), region = 69 }

</bundles_post_ra>
